<compile_context>
chip_gen: v7x
topology: tpu7x:2x2x1
jax: 0.10.0
libtpu: 0.0.40
codegen_flags: <defaults>
</compile_context>

<pallas_src>
import jax
import jax.numpy as jnp
from jax import lax
from jax.experimental import pallas as pl
from jax.experimental.pallas import tpu as pltpu


def _round_up(n, m):
    return ((n + m - 1) // m) * m


def _varpro_kernel(x_ref, w1t_ref, b1_ref, w2s_ref, o_ref):
    # x_ref:   (TB, in_dim)   f32 batch tile (streamed, double-buffered)
    # w1t_ref: (in_dim, PW)   bf16 feature weights, VMEM-resident
    # b1_ref:  (1, PW)        f32 feature bias, VMEM-resident
    # w2s_ref: (out_dim, PW)  bf16 outer weights pre-scaled by 1/width, resident
    # o_ref:   (out_dim, TB)  f32 output tile, transposed so the lane dim is TB
    xb = x_ref[...].astype(jnp.bfloat16)  # in-kernel cast: no extra HBM pass
    h = jnp.tanh(
        jnp.dot(xb, w1t_ref[...], preferred_element_type=jnp.float32)
        + b1_ref[...]
    )
    # (out_dim, PW) x (TB, PW) contracted on PW -> (out_dim, TB).
    # Lane-dense stores (TB is a multiple of 128); 1/width already folded in.
    o_ref[...] = lax.dot_general(
        w2s_ref[...],
        h.astype(jnp.bfloat16),
        dimension_numbers=(((1,), (1,)), ((), ())),
        preferred_element_type=jnp.float32,
    )


def _pick_tb(B, in_dim, pw, out_dim, batch_tile):
    """Width-aware batch-tile size (multiple of 128 for lane-dense output)."""
    # Per-row in-flight VMEM bytes: double-buffered f32 x tile + in-kernel bf16
    # copy, f32 hidden + bf16 copy, double-buffered f32 output tile.
    per_row = (2 * in_dim * 4 + in_dim * 2
               + pw * (4 + 2)
               + 2 * out_dim * 4)
    budget = 24 << 20  # conservative: fits v7x's 64 MiB/TC alongside weights
    tb_cap = max(128, (budget // per_row) // 128 * 128)
    tb = min(batch_tile, tb_cap)
    # Keep >= 2 grid steps when the batch permits (v7x: both TCs; all gens:
    # gives the DMA pipeline something to overlap).
    if B > 128:
        tb = min(tb, _round_up(-(-B // 2), 128))
    tb = max(128, (tb // 128) * 128)
    return tb


def varpro_forward(x, w1, b1, w2, *, width, batch_tile=512):
    """x: [B, in_dim]; w1: [width, in_dim]; b1: [width]; w2: [out_dim, width]."""
    B, in_dim = x.shape
    out_dim, w_width = w2.shape
    assert w_width == width

    # ---- weight prep (pad hidden width to a lane multiple; exact) ----------
    pw = _round_up(width, 128)
    w1t = (jnp.zeros((in_dim, pw), jnp.float32)
           .at[:, :width].set(w1.T).astype(jnp.bfloat16))
    b1p = jnp.zeros((1, pw), jnp.float32).at[:, :width].set(b1[None, :])
    w2s = (jnp.zeros((out_dim, pw), jnp.float32)
           .at[:, :width].set(w2 / width).astype(jnp.bfloat16))
    # TODO(synk): for very large width/in_dim, the resident weights themselves
    # exceed the VMEM budget; add a hidden-dim grid axis with an accumulator.

    x32 = x.astype(jnp.float32)  # no-op when x is already f32

    # ---- batch tiling: cdiv grid, no explicit padding of x ------------------
    tb = _pick_tb(B, in_dim, pw, out_dim, batch_tile)
    grid = (pl.cdiv(B, tb),)

    # ---- VMEM estimate; only raise the limit when actually needed ----------
    need = (
        2 * tb * in_dim * 4            # double-buffered f32 x tiles
        + tb * in_dim * 2              # in-kernel bf16 x copy
        + tb * pw * 4 + tb * pw * 2    # f32 hidden + bf16 copy
        + 2 * out_dim * tb * 4         # double-buffered f32 output tiles
        + in_dim * pw * 2 + pw * 4 + out_dim * pw * 2   # resident weights
        + (2 << 20)                    # compiler scratch slack
    )
    vmem_limit = int(min(need, 48 << 20)) if need > (16 << 20) else None

    out_t = pl.pallas_call(
        _varpro_kernel,
        out_shape=jax.ShapeDtypeStruct((out_dim, B), jnp.float32),
        grid_spec=pltpu.PrefetchScalarGridSpec(
            num_scalar_prefetch=0,
            grid=grid,
            in_specs=[
                pl.BlockSpec((tb, in_dim), lambda i: (i, 0)),
                pl.BlockSpec(memory_space=pltpu.MemorySpace.VMEM),  # w1t resident
                pl.BlockSpec(memory_space=pltpu.MemorySpace.VMEM),  # b1 resident
                pl.BlockSpec(memory_space=pltpu.MemorySpace.VMEM),  # w2s resident
            ],
            out_specs=pl.BlockSpec((out_dim, tb), lambda i: (0, i)),
        ),
        compiler_params=pltpu.CompilerParams(
            dimension_semantics=("parallel",),   # batch axis shards across TCs
            vmem_limit_bytes=vmem_limit,
        ),
    )(x32, w1t, b1p, w2s)

    # Tiny (out_dim x B) transpose back to the module's (B, out_dim) layout.
    return out_t.T


if __name__ == "__main__":
    # Small shapes consistent with the module; B deliberately not a multiple
    # of the tile to exercise the masked boundary block, and sized so the grid
    # has 2 steps (pipeline overlap + second TC on v7x).
    B, IN_DIM, WIDTH, OUT_DIM = 200, 32, 64, 4

    key = jax.random.PRNGKey(0)
    kx, k1, kb, k2 = jax.random.split(key, 4)

    x = jax.random.normal(kx, (B, IN_DIM), dtype=jnp.float32)
    # Deterministic "PyTorch-layout" parameters.
    w1 = jax.random.normal(k1, (WIDTH, IN_DIM), dtype=jnp.float32) * 0.1
    b1 = jax.random.normal(kb, (WIDTH,), dtype=jnp.float32) * 0.1
    w2 = jax.random.normal(k2, (OUT_DIM, WIDTH), dtype=jnp.float32) * 0.1

    out = varpro_forward(x, w1, b1, w2, width=WIDTH, batch_tile=128)
    out = jax.block_until_ready(out)

    # Pure-JAX f32 reference; bf16 matmul operands with f32 accumulation in
    # the kernel -> relaxed tolerance.
    ref = (jnp.tanh(x @ w1.T + b1) @ w2.T) / WIDTH
    assert out.shape == (B, OUT_DIM)
    assert out.dtype == jnp.float32
    assert jnp.allclose(out, ref, atol=2e-2, rtol=2e-2), "mismatch vs reference"

    print("KERNEL_OK")
</pallas_src>

<mosaic_0001>
module attributes {stable_mosaic.version = 11 : i64} {
  func.func @_varpro_kernel(%arg0: i32, %arg1: memref<128x32xf32, #tpu.memory_space<vmem>>, %arg2: memref<32x128xbf16, #tpu.memory_space<vmem>>, %arg3: memref<1x128xf32, #tpu.memory_space<vmem>>, %arg4: memref<4x128xbf16, #tpu.memory_space<vmem>>, %arg5: memref<4x128xf32, #tpu.memory_space<vmem>>) attributes {dimension_semantics = [#tpu.dimension_semantics<parallel>], iteration_bounds = array<i64: 2>, scalar_prefetch = 0 : i64, scratch_operands = 0 : i64, tpu.core_type = #tpu.core_type<tc>, window_params = [{transform_indices = @transform_0, window_bounds = array<i64: 128, 32>}, {pipeline_mode = #tpu.pipeline_mode<synchronous>, transform_indices = @transform_1, window_bounds = array<i64: 32, 128>}, {pipeline_mode = #tpu.pipeline_mode<synchronous>, transform_indices = @transform_2, window_bounds = array<i64: 1, 128>}, {pipeline_mode = #tpu.pipeline_mode<synchronous>, transform_indices = @transform_3, window_bounds = array<i64: 4, 128>}, {transform_indices = @transform_4, window_bounds = array<i64: 4, 128>}]} {
    %c0 = arith.constant 0 : index
    %c0_0 = arith.constant 0 : index
    %0 = vector.load %arg1[%c0, %c0_0] : memref<128x32xf32, #tpu.memory_space<vmem>>, vector<128x32xf32>
    %1 = arith.truncf %0 : vector<128x32xf32> to vector<128x32xbf16>
    %c0_1 = arith.constant 0 : index
    %c0_2 = arith.constant 0 : index
    %2 = vector.load %arg2[%c0_1, %c0_2] : memref<32x128xbf16, #tpu.memory_space<vmem>>, vector<32x128xbf16>
    %cst = arith.constant dense<0.000000e+00> : vector<128x128xf32>
    %3 = tpu.matmul %1, %2, %cst {dimension_numbers = #tpu.dot_dimension_numbers<[1], [0], [0], [1], [0, 0, 1, 1], [], []>} : vector<128x32xbf16>, vector<32x128xbf16>, vector<128x128xf32> -> vector<128x128xf32>
    %c0_3 = arith.constant 0 : index
    %c0_4 = arith.constant 0 : index
    %4 = vector.load %arg3[%c0_3, %c0_4] : memref<1x128xf32, #tpu.memory_space<vmem>>, vector<1x128xf32>
    %5 = vector.broadcast %4 : vector<1x128xf32> to vector<128x128xf32>
    %6 = arith.addf %3, %5 : vector<128x128xf32>
    %7 = math.tanh %6 : vector<128x128xf32>
    %c0_5 = arith.constant 0 : index
    %c0_6 = arith.constant 0 : index
    %8 = vector.load %arg4[%c0_5, %c0_6] : memref<4x128xbf16, #tpu.memory_space<vmem>>, vector<4x128xbf16>
    %9 = arith.truncf %7 : vector<128x128xf32> to vector<128x128xbf16>
    %cst_7 = arith.constant dense<0.000000e+00> : vector<4x128xf32>
    %10 = tpu.matmul %8, %9, %cst_7 {dimension_numbers = #tpu.dot_dimension_numbers<[1], [1], [0], [0], [0, 0, 1, 0], [], []>} : vector<4x128xbf16>, vector<128x128xbf16>, vector<4x128xf32> -> vector<4x128xf32>
    %c0_8 = arith.constant 0 : index
    %c0_9 = arith.constant 0 : index
    %11 = vector.load %arg5[%c0_8, %c0_9] : memref<4x128xf32, #tpu.memory_space<vmem>>, vector<4x128xf32>
    tpu.vector_store %arg5[%c0_8, %c0_9], %10 {strides = array<i32>} : memref<4x128xf32, #tpu.memory_space<vmem>>, vector<4x128xf32>,
    return
  }
  func.func @transform_0(%arg0: i32) -> (i32, i32) {
    %c0_i32 = arith.constant 0 : i32
    %c0_i32_0 = arith.constant 0 : i32
    return %arg0, %c0_i32 : i32, i32
  }
  func.func @transform_1(%arg0: i32) -> (i32, i32) {
    %c0_i32 = arith.constant 0 : i32
    %c0_i32_0 = arith.constant 0 : i32
    %c0_i32_1 = arith.constant 0 : i32
    return %c0_i32, %c0_i32_0 : i32, i32
  }
  func.func @transform_2(%arg0: i32) -> (i32, i32) {
    %c0_i32 = arith.constant 0 : i32
    %c0_i32_0 = arith.constant 0 : i32
    %c0_i32_1 = arith.constant 0 : i32
    return %c0_i32, %c0_i32_0 : i32, i32
  }
  func.func @transform_3(%arg0: i32) -> (i32, i32) {
    %c0_i32 = arith.constant 0 : i32
    %c0_i32_0 = arith.constant 0 : i32
    %c0_i32_1 = arith.constant 0 : i32
    return %c0_i32, %c0_i32_0 : i32, i32
  }
  func.func @transform_4(%arg0: i32) -> (i32, i32) {
    %c0_i32 = arith.constant 0 : i32
    %c0_i32_0 = arith.constant 0 : i32
    return %c0_i32, %arg0 : i32, i32
  }
}

</mosaic_0001>

<bundles_post_ra>
// kernel: tpu_custom_call.1
= control target key start
LH: loop header
LB: loop body
LE: loop exit
PB: predicated region body
PF: predicated region fallthrough
CT: control target
= control target key end

     0   :  { %9 = vsyncpa [#allocation3], 0  ;;  %s921_s0 = inlined_call_operand.vmem [shape: f32[200,32], index: 0, kind: input, shape index: {}]   ;;  %s922_s1 = inlined_call_operand.vmem [shape: bf16[32,128], index: 1, kind: input, shape index: {}]   ;;  %s923_s2 = inlined_call_operand.vmem [shape: f32[1,128], index: 2, kind: input, shape index: {}]   ;;  %s924_s3 = inlined_call_operand.vmem [shape: bf16[4,128], index: 3, kind: input, shape index: {}]   ;;  %s925_s4 = inlined_call_operand.hbm [shape: f32[4,200], index: 4, kind: output, shape index: {}]  }
   0x1   :  { %11 = vsyncpa [#allocation3 + $0x1], 0  ;;  %s775_s15 = smov 0   ;;  %s777_s16 = smov 0  }
   0x2   :  { %s779_s17 = smov 0   ;;  %s781_s18 = smov 0  }
   0x3 LB: > { %s796_s19 = sadd.s32 4294967295, %s745_s18   ;;  %s527_s20 = sadd.s32 4294967294, %s745_s18   ;;  %s745_s18 = sphi %s781_s18, %s931_s18   ;;  %s741_s17 = sphi %s779_s17, %s930_s17   ;;  %s737_s16 = sphi %s777_s16, %s929_s16   ;;  %s733_s15 = sphi %s775_s15, %s928_s15  }
   0x4   : > { %s800_s21 = sadd.s32 1, %s745_s18   ;;  %s113_s22 = sadd.s32 1, %s741_s17 }
   0x5   : > { %s110_s23 = ssub.s32 %s745_s18, %s800_s21  ;;  %p123_p0 = scmp.ne.s32.totalorder %s741_s17, %s737_s16 }
   0x6   : > { %p111_p1 = scmp.eq.s32.totalorder %s110_s23, 0  ;;  %p124_p2 = scmp.eq.s32.totalorder %s796_s19, 1 }
   0x7   : > { %p129_p3 = scmp.ne.s32.totalorder %s737_s16, %s733_s15  ;;  %p130_p4 = scmp.eq.s32.totalorder %s527_s20, 1 }
   0x8   : > { %s811_s24 = scalar_select %p111_p1, %s741_s17, %s113_s22  }
   0x9   : > { %p813_p5 = por %p124_p2, %p123_p0  ;;  %p817_p6 = por %p130_p4, %p129_p3 }
   0xa   : > { %p530_p7 = scmp.ge.s32.totalorder %s745_s18, 1  ;;  %p174_p8 = scmp.lt.s32.totalorder %s745_s18, 3 }
   0xc   : > { %p175_p9 = pnand %p530_p7, %p174_p8 }
   0xd   : > { %v649_v0 = vld [vmem:[%s922_s1] sm:$0xff] (!%p175_p9)   ;;  %s532_s29 = sshll.u32 (!%p175_p9), %s796_s19, 4  ;;  %v650_v1 = vld [vmem:[%s922_s1 + $0x8] sm:$0xff] (!%p175_p9)   ;;  %vm266_vm0 = vcmask (!%p175_p9), 261120   ;;  %v747_v26 = vmov (!%p175_p9), 0.0   ;;  %vm748_vm1 = vmmov (!%p175_p9), 0  }
   0xe   : > { %178 = sbr.rel (%p175_p9) target bundleno = 548 (0x224), region = 36  ;;  %p209_p10 = scmp.lt.s32.totalorder (!%p175_p9), %s532_s29, 24  ;;  %568 = vmatprep.subr.bf16.mxu0 (!%p175_p9), %v649_v0  ;;  %588 = vmatprep.subr.bf16.mxu1 (!%p175_p9), %v747_v26  ;;  %v534_v27 = vld [vmem:[%s923_s2] ss:$0 sm:$0xff] (!%p175_p9) }
   0xf   : > { %569 = vmatpush3.bf16.msra.mxu0 (!%p175_p9), %v649_v0  ;;  %604 = vmatprep.mubr.msk.bf16.mxu1 (!%p175_p9), %vm748_vm1, %v747_v26  ;;  %s201_s14 = sand.u32 (!%p175_p9), 1, %s737_s16   ;;  %s546_s27 = sshll.u32 (!%p175_p9), %s796_s19, 6 }
  0x10   : > { %570 = vmatprep.subr.bf16.mxu0 (!%p175_p9), %v650_v1  ;;  %s531_s20 = sshll.u32 (!%p175_p9), %s201_s14, 2  ;;  %s881_s30 = scalar_lea.hbm (!%p175_p9), %s925_s4, %s546_s27 }
  0x11   : > { %s203_s22 = scalar_lea.vmem (!%p175_p9), [#allocation2], %s531_s20  ;;  %s455_s5 = scalar_lea.sflag (!%p175_p9), [#allocation3], %s201_s14 }
  0x12   : > { %s468_s23 = sshll.u32 (!%p175_p9), %s203_s22, 4  ;;  %s749_s19 = smov (!%p175_p9), [#allocation2]   ;;  %s876_s23 = int_to_ptr.vmem [resolvable:$true] %s468_s23 }
  0x13   : > { %571 = vmatpush3.bf16.msra.mxu0 (!%p175_p9), %v650_v1  ;;  %s687_s7 = sshll.u32 (!%p175_p9), %s749_s19, 4  ;;  %s688_s7 = int_to_ptr.vmem [resolvable:$false] %s687_s7 }
  0x14   : > { %s689_s8 = scalar_lea.vmem (!%p175_p9), %s688_s7, 128  ;;  %p690_p0 = scmp.lt.s32.totalorder (!%p175_p9), %s876_s23, %s688_s7 }
  0x15   : > { %s933_s29 = smov (!%p209_p10, %s532_s29), 24 }
  0x16   : > { %s533_s6 = sshll.u32 %s933_s29, 3 }
  0x17   : > { %s833_s9 = scalar_lea.vmem %s921_s0, %s533_s6  ;;  %s683_s6 = scalar_lea.vmem %s876_s23, 64 }
  0x18   : > { %v219_v2 = vld [vmem:[%s833_s9] sm:$0xff]  ;;  %v220_v3 = vld [vmem:[%s833_s9 + $0x8] sm:$0xff]  ;;  %v221_v4 = vld [vmem:[%s833_s9 + $0x10] sm:$0xff]  ;;  %p684_p11 = scmp.ne.s32.totalorder %s876_s23, %s683_s6  ;;  %p691_p1 = scmp.lt.s32.totalorder %s689_s8, %s683_s6 }
  0x19   : > { %v235_v5 = vpack.c.bf16 %v220_v3, %v219_v2  ;;  %v222_v6 = vld [vmem:[%s833_s9 + $0x18] sm:$0xff]  ;;  %v223_v7 = vld [vmem:[%s833_s9 + $0x20] sm:$0xff]  ;;  %v224_v8 = vld [vmem:[%s833_s9 + $0x28] sm:$0xff] }
  0x1a   : > { %v236_v9 = vpack.c.bf16 %v222_v6, %v221_v4  ;;  %v237_v10 = vpack.c.bf16 %v224_v8, %v223_v7  ;;  %v225_v11 = vld [vmem:[%s833_s9 + $0x30] sm:$0xff]  ;;  %v226_v12 = vld [vmem:[%s833_s9 + $0x38] sm:$0xff]  ;;  %v227_v13 = vld [vmem:[%s833_s9 + $0x40] sm:$0xff]  ;;  %p685_p12 = pnand %p684_p11, %p813_p5  ;;  %p692_p2 = por %p691_p1, %p690_p0 }
  0x1b   : > { %572 = vmatprep.mubr.msk.bf16.mxu0 %vm266_vm0, %v235_v5  ;;  %v228_v14 = vld [vmem:[%s833_s9 + $0x48] sm:$0xff]  ;;  %v238_v15 = vpack.c.bf16 %v226_v12, %v225_v11  ;;  %v229_v17 = vld [vmem:[%s833_s9 + $0x50] sm:$0xff]  ;;  %v230_v18 = vld [vmem:[%s833_s9 + $0x58] sm:$0xff] }
  0x1c   : > { %573 = vmatmul.mubr.msk.bf16.vlgmr.msra.gmra.mrb[0].mxu0 %vm266_vm0, %v236_v9  ;;  %v239_v16 = vpack.c.bf16 %v228_v14, %v227_v13  ;;  %v231_v19 = vld [vmem:[%s833_s9 + $0x60] sm:$0xff]  ;;  %v232_v20 = vld [vmem:[%s833_s9 + $0x68] sm:$0xff]  ;;  %v240_v21 = vpack.c.bf16 %v230_v18, %v229_v17  ;;  %v233_v23 = vld [vmem:[%s833_s9 + $0x70] sm:$0xff]  ;;  %p686_p13 = pneg %p685_p12 }
  0x1d   : > { %576 = vmatprep.mubr.msk.bf16.mxu0 %vm266_vm0, %v237_v10  ;;  %v241_v22 = vpack.c.bf16 %v232_v20, %v231_v19  ;;  %v234_v24 = vld [vmem:[%s833_s9 + $0x78] sm:$0xff]  ;;  %v404_v20 = vld [vmem:[%s924_s3] sm:$0x3] }
  0x1e   : > { %v242_v25 = vpack.c.bf16 %v234_v24, %v233_v23  ;;  %p693_p3 = pnand %p692_p2, %p686_p13 }
  0x24   : > { %577 = vmatmul.mubr.msk.bf16.gmra.mrb[4].mxu0 %vm266_vm0, %v238_v15 }
  0x25   : > { %580 = vmatprep.mubr.msk.bf16.mxu0 %vm266_vm0, %v239_v16 }
  0x2c   : > { %581 = vmatmul.mubr.msk.bf16.gmra.mrb[8].mxu0 %vm266_vm0, %v240_v21 }
  0x2d   : > { %584 = vmatprep.mubr.msk.bf16.mxu0 %vm266_vm0, %v241_v22 }
  0x34   : > { %585 = vmatmul.mubr.msk.bf16.gmra.mrb[12].mxu0 %vm266_vm0, %v242_v25 }
  0xef   : > { %v574_v28 = vpop.f32.mrb[0].mxu0 }
  0xf0   : > { %v334_v29 = vadd.f32 %v574_v28, %v534_v27  ;;  %v325_v30 = vpop.f32.mrb[1].mxu0 }
  0xf1   : > { %v326_v31 = vadd.f32 %v534_v27, %v325_v30  ;;  %v575_v32 = vpop.f32.mrb[2].mxu0 }
  0xf2   : > { %651 = vtanh.f32 %v334_v29  ;;  %v337_v33 = vadd.f32 %v575_v32, %v534_v27  ;;  %v328_v34 = vpop.f32.mrb[3].mxu0 }
  0xf3   : > { %653 = vtanh.f32 %v326_v31  ;;  %v329_v35 = vadd.f32 %v534_v27, %v328_v34 }
  0xf4   : > { %655 = vtanh.f32 %v337_v33 }
  0xf5   : > { %657 = vtanh.f32 %v329_v35 }
  0xf7   : > { %v578_v36 = vpop.f32.mrb[4].mxu0 }
  0xf8   : > { %v350_v37 = vadd.f32 %v578_v36, %v534_v27  ;;  %v341_v38 = vpop.f32.mrb[5].mxu0 }
  0xf9   : > { %v342_v39 = vadd.f32 %v534_v27, %v341_v38  ;;  %v579_v40 = vpop.f32.mrb[6].mxu0 }
  0xfa   : > { %659 = vtanh.f32 %v350_v37  ;;  %v353_v41 = vadd.f32 %v579_v40, %v534_v27  ;;  %v344_v42 = vpop.f32.mrb[7].mxu0 }
  0xfb   : > { %661 = vtanh.f32 %v342_v39  ;;  %v345_v43 = vadd.f32 %v534_v27, %v344_v42 }
  0xfc   : > { %v652_v44 = vpop.eup %651  ;;  %663 = vtanh.f32 %v353_v41 }
  0xfd   : > { %v654_v45 = vpop.eup %653  ;;  %665 = vtanh.f32 %v345_v43 }
  0xfe   : > { %v656_v46 = vpop.eup %655 }
  0xff   : > { %v658_v47 = vpop.eup %657  ;;  %v406_v48 = vpack.c.bf16 %v656_v46, %v652_v44  ;;  %v582_v49 = vpop.f32.mrb[8].mxu0 }
 0x100   : > { %v405_v50 = vpack.c.bf16 %v658_v47, %v654_v45  ;;  %v366_v51 = vadd.f32 %v582_v49, %v534_v27  ;;  %v357_v52 = vpop.f32.mrb[9].mxu0 }
 0x101   : > { %v358_v53 = vadd.f32 %v534_v27, %v357_v52  ;;  %v583_v54 = vpop.f32.mrb[10].mxu0 }
 0x102   : > { %589 = vmatpush3.bf16.xpose.msra.mxu1 %v405_v50  ;;  %667 = vtanh.f32 %v366_v51  ;;  %v369_v55 = vadd.f32 %v583_v54, %v534_v27  ;;  %v360_v56 = vpop.f32.mrb[11].mxu0 }
 0x103   : > { %590 = vmatprep.subr.bf16.mxu1 %v747_v26  ;;  %669 = vtanh.f32 %v358_v53  ;;  %v361_v57 = vadd.f32 %v534_v27, %v360_v56 }
 0x104   : > { %v660_v58 = vpop.eup %659  ;;  %671 = vtanh.f32 %v369_v55 }
 0x105   : > { %v662_v59 = vpop.eup %661  ;;  %673 = vtanh.f32 %v361_v57 }
 0x106   : > { %v664_v60 = vpop.eup %663 }
 0x107   : > { %v666_v61 = vpop.eup %665  ;;  %v408_v62 = vpack.c.bf16 %v664_v60, %v660_v58  ;;  %v586_v63 = vpop.f32.mrb[12].mxu0 }
 0x108   : > { %v407_v0 = vpack.c.bf16 %v666_v61, %v662_v59  ;;  %v382_v1 = vadd.f32 %v586_v63, %v534_v27  ;;  %v373_v2 = vpop.f32.mrb[13].mxu0 }
 0x109   : > { %v374_v3 = vadd.f32 %v534_v27, %v373_v2  ;;  %v587_v4 = vpop.f32.mrb[14].mxu0 }
 0x10a   : > { %591 = vmatpush3.bf16.xpose.msra.mxu1 %v406_v48  ;;  %675 = vtanh.f32 %v382_v1  ;;  %v385_v5 = vadd.f32 %v587_v4, %v534_v27  ;;  %v376_v6 = vpop.f32.mrb[15].mxu0 }
 0x10b   : > { %592 = vmatprep.subr.bf16.mxu1 %v747_v26  ;;  %677 = vtanh.f32 %v374_v3  ;;  %v377_v7 = vadd.f32 %v534_v27, %v376_v6 }
 0x10c   : > { %v668_v8 = vpop.eup %667  ;;  %679 = vtanh.f32 %v385_v5 }
 0x10d   : > { %v670_v9 = vpop.eup %669  ;;  %681 = vtanh.f32 %v377_v7 }
 0x10e   : > { %v672_v10 = vpop.eup %671 }
 0x10f   : > { %v674_v11 = vpop.eup %673  ;;  %v410_v12 = vpack.c.bf16 %v672_v10, %v668_v8 }
 0x110   : > { %v409_v13 = vpack.c.bf16 %v674_v11, %v670_v9 }
 0x112   : > { %593 = vmatpush3.bf16.xpose.msra.mxu1 %v407_v0 }
 0x113   : > { %594 = vmatprep.subr.bf16.mxu1 %v747_v26 }
 0x114   : > { %v676_v14 = vpop.eup %675 }
 0x115   : > { %v678_v15 = vpop.eup %677 }
 0x116   : > { %v680_v16 = vpop.eup %679 }
 0x117   : > { %v682_v17 = vpop.eup %681  ;;  %v412_v18 = vpack.c.bf16 %v680_v16, %v676_v14 }
 0x118   : > { %v411_v19 = vpack.c.bf16 %v682_v17, %v678_v15 }
 0x11a   : > { %595 = vmatpush3.bf16.xpose.msra.mxu1 %v408_v62 }
 0x11b   : > { %596 = vmatprep.subr.bf16.mxu1 %v747_v26 }
 0x122   : > { %597 = vmatpush3.bf16.xpose.msra.mxu1 %v409_v13 }
 0x123   : > { %598 = vmatprep.subr.bf16.mxu1 %v747_v26 }
 0x12a   : > { %599 = vmatpush3.bf16.xpose.msra.mxu1 %v410_v12 }
 0x12b   : > { %600 = vmatprep.subr.bf16.mxu1 %v747_v26 }
 0x132   : > { %601 = vmatpush3.bf16.xpose.msra.mxu1 %v411_v19 }
 0x133   : > { %602 = vmatprep.subr.bf16.mxu1 %v747_v26 }
 0x13a   : > { %603 = vmatpush3.bf16.xpose.msra.mxu1 %v412_v18 }
 0x141   : > { %605 = vmatmul.mubr.bf16.vlgmr.msra.gmra.mrb[0].mxu1 %v404_v20 }
 0x214   : > { %v447_v21 = vpop.f32.mrb[0].mxu1 }
 0x215   : > { %453 = vst [vmem:[%s203_s22] sm:$0xf] %v447_v21  ;;  %v606_v22 = vpop.f32.mrb[1].mxu1 }
 0x216   : > { %v450_v23 = vpop.f32.mrb[2].mxu1 }
 0x217   : > { %696 = shalt.err (!%p693_p3)
}
 0x218   : > { %s697_s9 = scalar_lea.hbm %s881_s30, 64  ;;  %s701_s12 = scalar_lea.hbm %s925_s4, 128 }
 0x219   : > { %p698_p4 = scmp.ne.s32.totalorder %s881_s30, %s697_s9  ;;  %p702_p9 = scmp.lt.u32.totalorder %s881_s30, %s925_s4 }
 0x21a   : > { %p703_p10 = scmp.lt.u32.totalorder %s701_s12, %s697_s9  ;;  %p705_p12 = scmp.lt.u32.totalorder %s697_s9, %s881_s30 }
 0x21b   : > { %p699_p7 = pnand %p698_p4, %p813_p5 }
 0x21c   : > { %p704_p11 = por %p703_p10, %p702_p9 }
 0x21d   : > { %p700_p8 = pneg %p699_p7 }
 0x21e   : > { %p706_p13 = por %p705_p12, %p704_p11 }
 0x220   : > { %p707_p0 = pnand %p706_p13, %p700_p8 }
 0x222   : > { %710 = shalt.err (!%p707_p0)
}
 0x223   : > { %608 = dma.vmem_to_hbm [thread:$0]  (%p813_p5), %s876_s23, 64, %s881_s30, %s455_s5   ;;  %v607_v24 = vpop.f32.mrb[3].mxu1 }
 0x224 PF: > { %p614_p1 = scmp.ge.s32.totalorder %s745_s18, 2  ;;  %s480_s20 = sand.u32 1, %s733_s15  }
 0x225   : > { %s481_s22 = scalar_lea.sflag [#allocation3], %s480_s20 }
 0x226   : > { %p611_p2 = pnand %p614_p1, %p817_p6 }
 0x228   : > { %728 = dma.done.wait (!%p611_p2), %s481_s22, 64  }
 0x229   : > { %730 = vsyncadd (!%p611_p2), %s481_s22, 4294967232  ;;  %p14_p3 = scmp.ge.s32.totalorder %s800_s21, 4   ;;  %s928_s15 = smov %s737_s16 }
 0x22a   : > { %s929_s16 = smov %s741_s17  ;;  %s930_s17 = smov %s811_s24 }
 0x22b   : > { %s931_s18 = smov %s800_s21  ;;  %16 = sbr.rel (!%p14_p3) target bundleno = 3 (0x3), region = 71 }
 0x232   :  { %486 = vsyncpa [#allocation3], 1 }
 0x233   :  { %488 = vsyncpa [#allocation3 + $0x1], 1 }

</bundles_post_ra>
